<compile_context>
chip_gen: v7x
topology: tpu7x:2x2x1
jax: 0.10.0
libtpu: 0.0.40
codegen_flags: <defaults>
</compile_context>

<pallas_src>
import functools

import jax
import jax.numpy as jnp
from jax.experimental import pallas as pl
from jax.experimental.pallas import tpu as pltpu


def _cdiv(a, b):
    return -(-a // b)


def _round_up(a, m):
    return _cdiv(a, m) * m


def _largest_divisor(n, cap, step):
    """Largest k <= cap with k % step == 0 and n % k == 0, or None."""
    k = (min(cap, n) // step) * step
    while k >= step:
        if n % k == 0:
            return k
        k -= step
    return None


# ---------------------------------------------------------------------------
# kernels
# ---------------------------------------------------------------------------
def _sse_kernel_vpu(w_ref, x_ref, o_ref):
    """Small-C path.  w_ref: (1, C) f32 in SMEM; x_ref/o_ref: (1, C, R, 128)."""
    C = x_ref.shape[1]
    # 1x1x1 conv == per-voxel weighted sum over channels: short unrolled VPU
    # multiply-add chain with f32 accumulation (one channel slab live at a time;
    # no full-tile f32 upcast).
    acc = x_ref[0, 0].astype(jnp.float32) * w_ref[0, 0]
    for c in range(1, C):
        acc = acc + x_ref[0, c].astype(jnp.float32) * w_ref[0, c]
    gate = jax.nn.sigmoid(acc).astype(o_ref.dtype)           # (R, 128), sigmoid on EUP
    # gating multiply + store stay in the native dtype; (R,128) stores are lane-dense
    o_ref[0] = x_ref[0] * gate


def _sse_kernel_mxu(w_ref, x_ref, o_ref, *, precision):
    """Large-C path.  w_ref: (1, C) f32 in VMEM; x_ref/o_ref: (1, C, TS)."""
    x = x_ref[0]                                              # (C, TS), native dtype
    w = w_ref[...].astype(x.dtype)                            # (1, C)
    # channel reduction on the (otherwise idle) MXU, f32 accumulation
    q = jnp.dot(w, x, preferred_element_type=jnp.float32, precision=precision)
    gate = jax.nn.sigmoid(q).astype(o_ref.dtype)              # (1, TS)
    o_ref[0] = x * gate                                       # broadcast over C rows


# ---------------------------------------------------------------------------
# wrapper
# ---------------------------------------------------------------------------
def sse_forward(U, weight, *, tile_budget_bytes=2 << 20, vmem_limit_bytes=32 << 20):
    """U: (N, C, D, H, W); weight: (1, C, 1, 1, 1) as in nn.Conv3d(C, 1, 1, bias=False)."""
    N, C, D, H, W = U.shape
    S = D * H * W
    dtype = U.dtype
    itemsize = jnp.dtype(dtype).itemsize
    sublanes = {4: 8, 2: 16, 1: 32}.get(itemsize, 8)

    use_mxu = C >= 32
    min_steps = 8                                    # megacore split + pipeline overlap
    budget_rows = max(1, (tile_budget_bytes // max(1, C * itemsize)) // 128)
    granule_rows = 1 if use_mxu else sublanes        # block sublane-dim granularity
    rows_full = _cdiv(S, 128)                        # spatial extent in 128-lane units

    # ---- block selection along the flattened spatial axis (in 128-lane units) ----
    # Preferred: an exact divisor of the extent -> no host-side pad, i.e. no extra
    # full-array copy (which would ~3x the HBM traffic of this bandwidth-bound op).
    blk = None
    padded_rows = rows_full
    if S % 128 == 0:
        if rows_full <= budget_rows:
            blk = rows_full                          # full extent: always a legal block
        else:
            cand = _largest_divisor(rows_full, budget_rows, granule_rows)
            # accept unless the divisor constraint forced a pathologically small tile
            if cand is not None and cand * 8 >= min(budget_rows, rows_full):
                blk = cand
        if blk is not None:
            floor = max(granule_rows, budget_rows // 8)
            while blk > floor and N * (rows_full // blk) < min_steps:
                nxt = _largest_divisor(rows_full, blk // 2, granule_rows)
                if nxt is None or nxt < floor:
                    break
                blk = nxt
            padded_rows = rows_full

    if blk is None:
        # Fallback: granule-aligned block + zero pad of the flattened spatial axis
        # (keeps every block and every store dense / unmasked).
        blk = max(granule_rows, (budget_rows // granule_rows) * granule_rows)
        while blk > granule_rows and N * _cdiv(rows_full, blk) < min_steps:
            blk = max(granule_rows, ((blk // 2) // granule_rows) * granule_rows)
        if blk >= rows_full:
            blk = rows_full                          # full-extent spatial block
        padded_rows = _round_up(rows_full, blk)

    S_pad = padded_rows * 128
    tile = blk * 128

    x = U.reshape(N, C, S)
    if S_pad != S:
        x = jnp.pad(x, ((0, 0), (0, 0), (0, S_pad - S)))
    w = weight.reshape(1, C).astype(jnp.float32)

    grid = (N, padded_rows // blk)
    cparams = pltpu.CompilerParams(
        dimension_semantics=("parallel", "parallel"),
        vmem_limit_bytes=vmem_limit_bytes,
    )
    cost = pl.CostEstimate(
        flops=3 * N * C * S,                 # C MACs (conv) + 1 gating mul per voxel-chan
        transcendentals=N * S,               # one sigmoid per voxel
        bytes_accessed=2 * N * C * S_pad * itemsize + 4 * C,
    )

    if use_mxu:
        precision = (jax.lax.Precision.HIGHEST
                     if dtype == jnp.float32 else jax.lax.Precision.DEFAULT)
        kernel = functools.partial(_sse_kernel_mxu, precision=precision)
        out = pl.pallas_call(
            kernel,
            out_shape=jax.ShapeDtypeStruct((N, C, S_pad), dtype),
            grid_spec=pltpu.PrefetchScalarGridSpec(
                num_scalar_prefetch=0,
                grid=grid,
                in_specs=[
                    pl.BlockSpec((1, C), lambda n, s: (0, 0)),              # weight (VMEM)
                    pl.BlockSpec((1, C, tile), lambda n, s: (n, 0, s)),     # input tile
                ],
                out_specs=pl.BlockSpec((1, C, tile), lambda n, s: (n, 0, s)),
            ),
            compiler_params=cparams,
            cost_estimate=cost,
        )(w, x)
    else:
        # small C: put spatial on both sublanes and lanes so every vreg and every
        # store is fully dense (C < 8 f32 / 16 bf16 would otherwise waste sublanes)
        x4 = x.reshape(N, C, padded_rows, 128)
        out = pl.pallas_call(
            _sse_kernel_vpu,
            out_shape=jax.ShapeDtypeStruct((N, C, padded_rows, 128), dtype),
            grid_spec=pltpu.PrefetchScalarGridSpec(
                num_scalar_prefetch=0,
                grid=grid,
                in_specs=[
                    # tiny weight vector lives in SMEM; read as scalars in-kernel
                    pl.BlockSpec(memory_space=pltpu.MemorySpace.SMEM),
                    pl.BlockSpec((1, C, blk, 128), lambda n, s: (n, 0, s, 0)),
                ],
                out_specs=pl.BlockSpec((1, C, blk, 128), lambda n, s: (n, 0, s, 0)),
            ),
            compiler_params=cparams,
            cost_estimate=cost,
        )(w, x4)
        out = out.reshape(N, C, S_pad)

    if S_pad != S:
        out = out[:, :, :S]
    return out.reshape(N, C, D, H, W)


# ---------------------------------------------------------------------------
# reference + demo
# ---------------------------------------------------------------------------
def _reference(U, weight):
    C = U.shape[1]
    q = jnp.einsum(
        "ncdhw,oc->nodhw",
        U.astype(jnp.float32),
        weight.reshape(1, C).astype(jnp.float32),
        precision=jax.lax.Precision.HIGHEST,
    )
    return (U.astype(jnp.float32) * jax.nn.sigmoid(q)).astype(U.dtype)


if __name__ == "__main__":
    key = jax.random.PRNGKey(0)
    k1, k2, k3, k4, k5, k6 = jax.random.split(key, 6)

    # --- small-C (VPU) path, spatial a multiple of 128 (no-pad branch) -------
    N, C, D, H, W = 2, 4, 8, 8, 8
    U = jax.random.normal(k1, (N, C, D, H, W), dtype=jnp.float32)
    weight = jax.random.normal(k2, (1, C, 1, 1, 1), dtype=jnp.float32) * 0.1
    out = jax.block_until_ready(sse_forward(U, weight))
    ref = _reference(U, weight)
    assert jnp.allclose(out, ref, atol=1e-5, rtol=1e-5), "VPU path mismatch"

    # --- small-C (VPU) path, ragged spatial extent (pad-fallback branch) -----
    N3, C3, D3, H3, W3 = 2, 4, 5, 6, 7
    U3 = jax.random.normal(k5, (N3, C3, D3, H3, W3), dtype=jnp.float32)
    weight3 = jax.random.normal(k6, (1, C3, 1, 1, 1), dtype=jnp.float32) * 0.1
    out3 = jax.block_until_ready(sse_forward(U3, weight3))
    ref3 = _reference(U3, weight3)
    assert jnp.allclose(out3, ref3, atol=1e-5, rtol=1e-5), "VPU ragged path mismatch"

    # --- large-C (MXU) path ---------------------------------------------------
    N2, C2, D2, H2, W2 = 2, 64, 8, 8, 8
    U2 = jax.random.normal(k3, (N2, C2, D2, H2, W2), dtype=jnp.float32)
    weight2 = jax.random.normal(k4, (1, C2, 1, 1, 1), dtype=jnp.float32) * 0.1
    out2 = jax.block_until_ready(sse_forward(U2, weight2))
    ref2 = _reference(U2, weight2)
    assert jnp.allclose(out2, ref2, atol=1e-4, rtol=1e-4), "MXU path mismatch"

    print("KERNEL_OK")
</pallas_src>

<mosaic_0001>
module attributes {stable_mosaic.version = 11 : i64} {
  func.func @_sse_kernel_vpu(%arg0: i32, %arg1: i32, %arg2: memref<1x4xf32, #tpu.memory_space<smem>>, %arg3: memref<1x4x4x128xf32, #tpu.memory_space<vmem>>, %arg4: memref<1x4x4x128xf32, #tpu.memory_space<vmem>>) attributes {dimension_semantics = [#tpu.dimension_semantics<parallel>, #tpu.dimension_semantics<parallel>], iteration_bounds = array<i64: 2, 1>, scalar_prefetch = 0 : i64, scratch_operands = 0 : i64, tpu.core_type = #tpu.core_type<tc>, window_params = [{transform_indices = @transform_0, window_bounds = array<i64: 1, 4>}, {transform_indices = @transform_1, window_bounds = array<i64: 1, 4, 4, 128>}, {transform_indices = @transform_2, window_bounds = array<i64: 1, 4, 4, 128>}]} {
    %c0 = arith.constant 0 : index
    %c0_0 = arith.constant 0 : index
    %c0_1 = arith.constant 0 : index
    %c0_2 = arith.constant 0 : index
    %0 = vector.load %arg3[%c0, %c0_0, %c0_1, %c0_2] : memref<1x4x4x128xf32, #tpu.memory_space<vmem>>, vector<1x1x4x128xf32>
    %1 = vector.shape_cast %0 : vector<1x1x4x128xf32> to vector<4x128xf32>
    %c0_3 = arith.constant 0 : index
    %c0_4 = arith.constant 0 : index
    %2 = memref.load %arg2[%c0_3, %c0_4] : memref<1x4xf32, #tpu.memory_space<smem>>
    %3 = vector.broadcast %2 : f32 to vector<4x128xf32>
    %4 = arith.mulf %1, %3 : vector<4x128xf32>
    %c0_5 = arith.constant 0 : index
    %c1 = arith.constant 1 : index
    %c0_6 = arith.constant 0 : index
    %c0_7 = arith.constant 0 : index
    %5 = vector.load %arg3[%c0_5, %c1, %c0_6, %c0_7] : memref<1x4x4x128xf32, #tpu.memory_space<vmem>>, vector<1x1x4x128xf32>
    %6 = vector.shape_cast %5 : vector<1x1x4x128xf32> to vector<4x128xf32>
    %c0_8 = arith.constant 0 : index
    %c1_9 = arith.constant 1 : index
    %7 = memref.load %arg2[%c0_8, %c1_9] : memref<1x4xf32, #tpu.memory_space<smem>>
    %8 = vector.broadcast %7 : f32 to vector<4x128xf32>
    %9 = arith.mulf %6, %8 : vector<4x128xf32>
    %10 = arith.addf %4, %9 : vector<4x128xf32>
    %c0_10 = arith.constant 0 : index
    %c2 = arith.constant 2 : index
    %c0_11 = arith.constant 0 : index
    %c0_12 = arith.constant 0 : index
    %11 = vector.load %arg3[%c0_10, %c2, %c0_11, %c0_12] : memref<1x4x4x128xf32, #tpu.memory_space<vmem>>, vector<1x1x4x128xf32>
    %12 = vector.shape_cast %11 : vector<1x1x4x128xf32> to vector<4x128xf32>
    %c0_13 = arith.constant 0 : index
    %c2_14 = arith.constant 2 : index
    %13 = memref.load %arg2[%c0_13, %c2_14] : memref<1x4xf32, #tpu.memory_space<smem>>
    %14 = vector.broadcast %13 : f32 to vector<4x128xf32>
    %15 = arith.mulf %12, %14 : vector<4x128xf32>
    %16 = arith.addf %10, %15 : vector<4x128xf32>
    %c0_15 = arith.constant 0 : index
    %c3 = arith.constant 3 : index
    %c0_16 = arith.constant 0 : index
    %c0_17 = arith.constant 0 : index
    %17 = vector.load %arg3[%c0_15, %c3, %c0_16, %c0_17] : memref<1x4x4x128xf32, #tpu.memory_space<vmem>>, vector<1x1x4x128xf32>
    %18 = vector.shape_cast %17 : vector<1x1x4x128xf32> to vector<4x128xf32>
    %c0_18 = arith.constant 0 : index
    %c3_19 = arith.constant 3 : index
    %19 = memref.load %arg2[%c0_18, %c3_19] : memref<1x4xf32, #tpu.memory_space<smem>>
    %20 = vector.broadcast %19 : f32 to vector<4x128xf32>
    %21 = arith.mulf %18, %20 : vector<4x128xf32>
    %22 = arith.addf %16, %21 : vector<4x128xf32>
    %23 = arith.negf %22 : vector<4x128xf32>
    %24 = math.exp %23 : vector<4x128xf32>
    %cst = arith.constant 1.000000e+00 : f32
    %25 = vector.broadcast %cst : f32 to vector<4x128xf32>
    %26 = arith.addf %25, %24 : vector<4x128xf32>
    %27 = arith.divf %25, %26 : vector<4x128xf32>
    %c0_20 = arith.constant 0 : index
    %c0_21 = arith.constant 0 : index
    %c0_22 = arith.constant 0 : index
    %c0_23 = arith.constant 0 : index
    %28 = vector.load %arg3[%c0_20, %c0_21, %c0_22, %c0_23] : memref<1x4x4x128xf32, #tpu.memory_space<vmem>>, vector<1x4x4x128xf32>
    %29 = vector.shape_cast %28 : vector<1x4x4x128xf32> to vector<4x4x128xf32>
    %30 = vector.shape_cast %27 : vector<4x128xf32> to vector<1x4x128xf32>
    %31 = vector.broadcast %30 : vector<1x4x128xf32> to vector<4x4x128xf32>
    %32 = arith.mulf %29, %31 : vector<4x4x128xf32>
    %c0_24 = arith.constant 0 : index
    %c0_25 = arith.constant 0 : index
    %c0_26 = arith.constant 0 : index
    %c0_27 = arith.constant 0 : index
    %33 = vector.load %arg4[%c0_24, %c0_25, %c0_26, %c0_27] : memref<1x4x4x128xf32, #tpu.memory_space<vmem>>, vector<1x4x4x128xf32>
    %34 = vector.shape_cast %33 : vector<1x4x4x128xf32> to vector<4x4x128xf32>
    %35 = vector.shape_cast %32 : vector<4x4x128xf32> to vector<1x4x4x128xf32>
    tpu.vector_store %arg4[%c0_24, %c0_25, %c0_26, %c0_27], %35 {strides = array<i32>} : memref<1x4x4x128xf32, #tpu.memory_space<vmem>>, vector<1x4x4x128xf32>,
    return
  }
  func.func @transform_0(%arg0: i32, %arg1: i32) -> (i32, i32) {
    %c0_i32 = arith.constant 0 : i32
    %c0_i32_0 = arith.constant 0 : i32
    %c0_i32_1 = arith.constant 0 : i32
    return %c0_i32, %c0_i32_0 : i32, i32
  }
  func.func @transform_1(%arg0: i32, %arg1: i32) -> (i32, i32, i32, i32) {
    %c0_i32 = arith.constant 0 : i32
    %c0_i32_0 = arith.constant 0 : i32
    %c0_i32_1 = arith.constant 0 : i32
    return %arg0, %c0_i32, %arg1, %c0_i32_0 : i32, i32, i32, i32
  }
  func.func @transform_2(%arg0: i32, %arg1: i32) -> (i32, i32, i32, i32) {
    %c0_i32 = arith.constant 0 : i32
    %c0_i32_0 = arith.constant 0 : i32
    %c0_i32_1 = arith.constant 0 : i32
    return %arg0, %c0_i32, %arg1, %c0_i32_0 : i32, i32, i32, i32
  }
}

</mosaic_0001>

<bundles_post_ra>
// kernel: tpu_custom_call.1
= control target key start
LH: loop header
LB: loop body
LE: loop exit
PB: predicated region body
PF: predicated region fallthrough
CT: control target
= control target key end

     0   :  { %7 = vsyncpa [#allocation5], 0  ;;  %s818_s0 = inlined_call_operand.hbm [shape: f32[1,4], index: 0, kind: input, shape index: {}]   ;;  %s819_s1 = inlined_call_operand.hbm [shape: f32[2,4,4,128], index: 1, kind: input, shape index: {}]   ;;  %s820_s2 = inlined_call_operand.hbm [shape: f32[2,4,4,128], index: 2, kind: output, shape index: {}]  }
   0x1   :  { %8 = vsyncpa [#allocation3], 0 }
   0x2   :  { %10 = vsyncpa [#allocation3 + $0x1], 0 }
   0x3   :  { %11 = vsyncpa [#allocation4], 0 }
   0x4   :  { %13 = vsyncpa [#allocation4 + $0x1], 0  ;;  %s603_s9 = smov 0   ;;  %s605_s10 = smov 0  }
   0x5   :  { %s607_s11 = smov 0   ;;  %s609_s12 = smov 0  }
   0x6   :  { %s611_s13 = smov 0   ;;  %s613_s14 = smov 0  }
   0x7 LB: > { %s343_s15 = sadd.s32 4294967295, %s579_s14   ;;  %s344_s16 = sadd.s32 4294967294, %s579_s14   ;;  %s579_s14 = sphi %s613_s14, %s19_s14   ;;  %s575_s13 = sphi %s611_s13, %s840_s13   ;;  %s571_s12 = sphi %s609_s12, %s839_s12   ;;  %s567_s11 = sphi %s607_s11, %s838_s11   ;;  %s563_s10 = sphi %s605_s10, %s837_s10   ;;  %s559_s9 = sphi %s603_s9, %s836_s9  }
   0x8   : > { %s61_s17 = sadd.s32 1, %s567_s11  ;;  %p68_p0 = scmp.ne.s32.totalorder %s567_s11, %s563_s10 }
   0x9   : > { %p69_p1 = scmp.eq.s32.totalorder %s579_s14, 0  ;;  %p74_p2 = scmp.ne.s32.totalorder %s563_s10, %s559_s9 }
   0xa   : > { %p641_p3 = scmp.eq.s32.totalorder %s343_s15, 0  ;;  %p100_p4 = scmp.eq.s32.totalorder %s343_s15, 1 }
   0xb   : > { %p70_p5 = por %p69_p1, %p68_p0  ;;  %p106_p6 = scmp.eq.s32.totalorder %s344_s16, 1 }
   0xc   : > { %s825_s18 = scalar_select %p641_p3, 1, 0 }
   0xd   : > { %p647_p7 = por %p641_p3, %p74_p2  ;;  %p651_p8 = por %p100_p4, %p68_p0 }
   0xe   : > { %p655_p9 = por %p106_p6, %p74_p2  ;;  %p345_p10 = scmp.ge.s32.totalorder %s579_s14, 1 }
   0xf   : > { %s826_s19 = scalar_select %p647_p7, 1, 0 }
  0x10   : > { %s827_s20 = scalar_select %p651_p8, 1, 0 }
  0x11   : > { %s828_s21 = scalar_select %p655_p9, 1, 0 }
  0x12   : > { %p113_p11 = scmp.lt.s32.totalorder %s579_s14, 3  ;;  %p390_p1 = scmp.lt.s32.totalorder %s579_s14, 2 }
  0x13   : > { %s135_s23 = sand.u32 1, %s567_s11   ;;  %s31_s25 = sadd.s32 1, %s575_s13 }
  0x14   : > { %p662_p13 = pnand %p345_p10, %p113_p11  ;;  %p670_p0 = pnand %p390_p1, %p70_p5 }
  0x15   : > { %s348_s26 = sshll.u32 %s135_s23, 4  ;;  %p33_p4 = scmp.ge.s32.totalorder %s31_s25, 2 }
  0x16   : > { %p377_p7 = pneg %p662_p13  ;;  %s450_s29 = scalar_lea.hbm %s818_s0, 16 }
  0x17   : > { %p451_p6 = scmp.ne.s32.totalorder %s818_s0, %s450_s29  ;;  %p457_p5 = scmp.lt.u32.totalorder %s450_s29, %s818_s0 }
  0x18   : > { %p378_p2 = pnand %p377_p7, %p641_p3 }
  0x1a   : > { %p452_p10 = pneg %p378_p2 }
  0x1c   : > { %p453_p11 = pnand %p452_p10, %p451_p6 }
  0x1e   : > { %p454_p12 = pneg %p453_p11 }
  0x20   : > { %p459_p1 = pnand %p457_p5, %p454_p12 }
  0x22   : > { %462 = shalt.err (!%p459_p1)
}
  0x23   : > { %s581_s6 = smov [#allocation2]   ;;  %s842_s25 = smov (%p33_p4, %s31_s25), 0 }
  0x24   : > { %380 = dma.hbm_to_smem (!%p378_p2), %s818_s0, 16, %s581_s6, [#allocation5]  }
  0x25   : > { %s367_s15 = sshll.u32 %s575_s13, 8  ;;  %s56_s16 = ssub.s32 %s575_s13, %s842_s25 }
  0x26   : > { %s697_s29 = scalar_lea.hbm %s819_s1, %s367_s15  ;;  %p59_p7 = scmp.eq.s32.totalorder %s56_s16, 0 }
  0x27   : > { %s139_s30 = scalar_lea.vmem [#allocation6], %s348_s26  ;;  %s706_s5 = scalar_lea.sflag [#allocation3], %s135_s23 }
  0x28   : > { %s147_s3 = sshll.u32 %s139_s30, 4  ;;  %s463_s6 = scalar_lea.hbm %s697_s29, 256  ;;  %s699_s3 = int_to_ptr.vmem [resolvable:$true] %s147_s3 }
  0x29   : > { %s704_s4 = scalar_select %p59_p7, %s567_s11, %s61_s17  }
  0x2a   : > { %p464_p12 = scmp.ne.s32.totalorder %s697_s29, %s463_s6  ;;  %p465_p2 = pneg %p670_p0 }
  0x2b   : > { %s468_s26 = scalar_lea.hbm %s819_s1, 512  ;;  %p469_p10 = scmp.lt.u32.totalorder %s697_s29, %s819_s1 }
  0x2c   : > { %p466_p4 = pnand %p465_p2, %p464_p12  ;;  %p470_p11 = scmp.lt.u32.totalorder %s468_s26, %s463_s6 }
  0x2d   : > { %p472_p1 = scmp.lt.u32.totalorder %s463_s6, %s697_s29 }
  0x2e   : > { %p467_p6 = pneg %p466_p4  ;;  %p471_p5 = por %p470_p11, %p469_p10 }
  0x30   : > { %p473_p7 = por %p472_p1, %p471_p5 }
  0x32   : > { %p474_p9 = pnand %p473_p7, %p467_p6 }
  0x34   : > { %477 = shalt.err (!%p474_p9)
}
  0x35   : > { %s478_s17 = scalar_lea.vmem %s699_s3, 256  ;;  %s582_s23 = smov [#allocation6]  }
  0x36   : > { %p479_p12 = scmp.ne.s32.totalorder %s699_s3, %s478_s17  ;;  %s483_s27 = sshll.u32 %s582_s23, 4  ;;  %s484_s27 = int_to_ptr.vmem [resolvable:$false] %s483_s27 }
  0x37   : > { %s485_s28 = scalar_lea.vmem %s484_s27, 512  ;;  %p486_p3 = scmp.lt.s32.totalorder %s699_s3, %s484_s27 }
  0x38   : > { %p481_p4 = pnand %p479_p12, %p465_p2  ;;  %p487_p10 = scmp.lt.s32.totalorder %s485_s28, %s478_s17 }
  0x3a   : > { %p482_p8 = pneg %p481_p4  ;;  %p488_p11 = por %p487_p10, %p486_p3 }
  0x3c   : > { %p489_p5 = pnand %p488_p11, %p482_p8 }
  0x3e   : > { %492 = shalt.err (!%p489_p5)
}
  0x3f   : > { %s583_s30 = smov 64   ;;  %s584_s6 = smov 4  }
  0x40   : > { %384 = dma.hbm_to_vmem [thread:$0]  (!%p670_p0), %s697_s29, 256, %s699_s3, %s706_s5, %s583_s30, %s583_s30, %s584_s6  }
  0x41   : > { %159 = sbr.rel (%p662_p13) target bundleno = 138 (0x8a), region = 28  ;;  %p831_p9 = scmp.ne.s32.totalorder (!%p662_p13), %s825_s18, 0 }
  0x48   : > { %546 = dma.done.wait (%p831_p9), [#allocation5], 16  }
  0x49   : > { %548 = vsyncadd (%p831_p9), [#allocation5], 4294967280  ;;  %s741_s7 = sand.u32 1, %s563_s10   ;;  %p832_p3 = scmp.ne.s32.totalorder %s826_s19, 0 }
  0x4a   : > { %s353_s8 = sshll.u32 %s741_s7, 4  ;;  %s166_s26 = scalar_lea.sflag [#allocation3], %s741_s7 }
  0x4b   : > { %s747_s24 = scalar_lea.vmem [#allocation6], %s353_s8 }
  0x4c   : > { %550 = dma.done.wait (%p832_p3), %s166_s26, 256  }
  0x4d   : > { %552 = vsyncadd (%p832_p3), %s166_s26, 4294967040 }
  0x4e   : > { %174 = sfence }
  0x4f   : > { %s192_s18 = sld [smem:[#allocation2]]  ;;  %s356_s22 = sld [smem:[#allocation2 + $0x1]]  ;;  %v191_v0 = vld [vmem:[%s747_s24] sm:$0xf]  ;;  %v355_v1 = vld [vmem:[%s747_s24 + $0x4] sm:$0xf] }
  0x50   : > { %s358_s29 = sld [smem:[#allocation2 + $0x2]]  ;;  %s360_s3 = sld [smem:[#allocation2 + $0x3]]  ;;  %v357_v3 = vld [vmem:[%s747_s24 + $0x8] sm:$0xf]  ;;  %v359_v6 = vld [vmem:[%s747_s24 + $0xc] sm:$0xf] }
  0x51   : > { %v219_v18 = vld [vmem:[%s747_s24] sm:$0xf]  ;;  %s190_s19 = scalar_lea.vmem [#allocation7], %s353_s8  ;;  %s368_s15 = sshll.u32 %s571_s12, 8  ;;  %v220_v19 = vld [vmem:[%s747_s24 + $0x4] sm:$0xf] }
  0x52   : > { %s246_s5 = sshll.u32 %s190_s19, 4  ;;  %v221_v20 = vld [vmem:[%s747_s24 + $0x8] sm:$0xf]  ;;  %v222_v21 = vld [vmem:[%s747_s24 + $0xc] sm:$0xf]  ;;  %s769_s23 = scalar_lea.hbm %s820_s2, %s368_s15  ;;  %s764_s5 = int_to_ptr.vmem [resolvable:$true] %s246_s5 }
  0x53   : > { %s232_s12 = scalar_lea.sflag [#allocation4], %s741_s7  ;;  %s493_s27 = scalar_lea.vmem %s764_s5, 256 }
  0x54   : > { %p494_p8 = scmp.ne.s32.totalorder %s764_s5, %s493_s27  ;;  %p833_p13 = scmp.ne.s32.totalorder %s827_s20, 0 }
  0x55   : > { %v193_v2 = vstv %s192_s18  ;;  %v198_v5 = vstv %s356_s22  ;;  %s585_s28 = smov [#allocation7]  }
  0x56   : > { %v194_v4 = vmul.f32 %v193_v2, %v191_v0  ;;  %v199_v7 = vmul.f32 %v355_v1, %v198_v5  ;;  %v204_v8 = vstv %s358_s29  ;;  %v210_v9 = vstv %s360_s3  ;;  %p495_p0 = pnand %p494_p8, %p833_p13  ;;  %s497_s30 = sshll.u32 %s585_s28, 4  ;;  %s498_s30 = int_to_ptr.vmem [resolvable:$false] %s497_s30 }
  0x57   : > { %v205_v10 = vmul.f32 %v357_v3, %v204_v8  ;;  %v211_v12 = vmul.f32 %v359_v6, %v210_v9  ;;  %s499_s6 = scalar_lea.vmem %s498_s30, 512  ;;  %p500_p6 = scmp.lt.s32.totalorder %s764_s5, %s498_s30 }
  0x58   : > { %v200_v11 = vadd.f32 %v199_v7, %v194_v4  ;;  %p496_p2 = pneg %p495_p0  ;;  %p501_p1 = scmp.lt.s32.totalorder %s499_s6, %s493_s27 }
  0x5a   : > { %v206_v13 = vadd.f32 %v205_v10, %v200_v11  ;;  %p502_p7 = por %p501_p1, %p500_p6 }
  0x5c   : > { %v212_v14 = vadd.f32 %v211_v12, %v206_v13  ;;  %p503_p12 = pnand %p502_p7, %p496_p2 }
  0x5e   : > { %v361_v15 = vmul.f32 -1.442695, %v212_v14 }
  0x60   : > { %446 = vpow2.f32 %v361_v15 }
  0x6a   : > { %v447_v16 = vpop.eup %446 }
  0x6b   : > { %v216_v17 = vadd.f32 1.0, %v447_v16 }
  0x6d   : > { %448 = vrcp.f32 %v216_v17 }
  0x77   : > { %v449_v22 = vpop.eup %448 }
  0x78   : > { %v223_v23 = vmul.f32 %v449_v22, %v219_v18  ;;  %v224_v24 = vmul.f32 %v449_v22, %v220_v19  ;;  %v225_v25 = vmul.f32 %v449_v22, %v221_v20  ;;  %v226_v26 = vmul.f32 %v449_v22, %v222_v21 }
  0x7a   : > { %227 = vst [vmem:[%s190_s19] sm:$0xf] %v223_v23  ;;  %228 = vst [vmem:[%s190_s19 + $0x4] sm:$0xf] %v224_v24 }
  0x7b   : > { %229 = vst [vmem:[%s190_s19 + $0x8] sm:$0xf] %v225_v25  ;;  %230 = vst [vmem:[%s190_s19 + $0xc] sm:$0xf] %v226_v26 }
  0x7c   : > { %506 = shalt.err (!%p503_p12)
}
  0x7d   : > { %s507_s8 = scalar_lea.hbm %s769_s23, 256  ;;  %s511_s18 = scalar_lea.hbm %s820_s2, 512 }
  0x7e   : > { %p508_p4 = scmp.ne.s32.totalorder %s769_s23, %s507_s8  ;;  %p512_p5 = scmp.lt.u32.totalorder %s769_s23, %s820_s2 }
  0x7f   : > { %p513_p9 = scmp.lt.u32.totalorder %s511_s18, %s507_s8  ;;  %p515_p8 = scmp.lt.u32.totalorder %s507_s8, %s769_s23 }
  0x80   : > { %p509_p10 = pnand %p508_p4, %p833_p13 }
  0x81   : > { %p514_p3 = por %p513_p9, %p512_p5 }
  0x82   : > { %p510_p11 = pneg %p509_p10 }
  0x83   : > { %p516_p0 = por %p515_p8, %p514_p3 }
  0x85   : > { %p517_p2 = pnand %p516_p0, %p510_p11 }
  0x87   : > { %520 = shalt.err (!%p517_p2)
}
  0x88   : > { %s586_s3 = smov 64   ;;  %s587_s19 = smov 4  }
  0x89   : > { %375 = dma.vmem_to_hbm [thread:$0]  (%p833_p13), %s764_s5, 256, %s769_s23, %s232_s12, %s586_s3, %s586_s3, %s587_s19  }
  0x8a PF: > { %s261_s15 = sand.u32 1, %s559_s9   ;;  %p834_p6 = scmp.ne.s32.totalorder %s828_s21, 0 }
  0x8b   : > { %p835_p1 = scmp.ge.s32.totalorder %s579_s14, 2  ;;  %s262_s16 = scalar_lea.sflag [#allocation4], %s261_s15 }
  0x8d   : > { %p386_p7 = pnand %p835_p1, %p834_p6 }
  0x8f   : > { %554 = dma.done.wait (!%p386_p7), %s262_s16, 256  }
  0x90   : > { %556 = vsyncadd (!%p386_p7), %s262_s16, 4294967040  ;;  %s19_s14 = sadd.s32 1, %s579_s14   ;;  %s836_s9 = smov %s563_s10 }
  0x91   : > { %p16_p12 = scmp.ge.s32.totalorder %s19_s14, 4   ;;  %s837_s10 = smov %s567_s11 }
  0x92   : > { %s838_s11 = smov %s704_s4  ;;  %s839_s12 = smov %s575_s13 }
  0x93   : > { %s840_s13 = smov %s842_s25  ;;  %18 = sbr.rel (!%p16_p12) target bundleno = 7 (0x7), region = 81 }
  0x9a   :  { %267 = vsyncpa [#allocation3], 1 }
  0x9b   :  { %269 = vsyncpa [#allocation3 + $0x1], 1 }
  0x9c   :  { %270 = vsyncpa [#allocation4], 1 }
  0x9d   :  { %272 = vsyncpa [#allocation4 + $0x1], 1 }
  0x9e   :  { %273 = vsyncpa [#allocation5], 1 }
  0x9f   :  { %275 = vsyncpa [#allocation5 + $0x1], 1 }

</bundles_post_ra>
